<compile_context>
chip_gen: v7x
topology: tpu7x:2x2x1
jax: 0.10.0
libtpu: 0.0.40
codegen_flags: <defaults>
</compile_context>

<pallas_src>
import functools

import jax
import jax.numpy as jnp
from jax.experimental import pallas as pl
from jax.experimental.pallas import tpu as pltpu


# ----------------------------- Pallas kernel -------------------------------

def _fused_matmul_kernel(x_ref, w_ref, scale_ref, bias_ref, o_ref, acc_ref, *,
                         relu):
    """Grid = (M tiles, N tiles, K tiles); K is the innermost reduction axis."""
    @pl.when(pl.program_id(2) == 0)
    def _():
        acc_ref[...] = jnp.zeros_like(acc_ref)

    acc_ref[...] += jnp.dot(x_ref[...], w_ref[...],
                            preferred_element_type=jnp.float32)

    @pl.when(pl.program_id(2) == pl.num_programs(2) - 1)
    def _():
        out = acc_ref[...] * scale_ref[...] + bias_ref[...]   # BN / bias epilogue (f32)
        if relu:
            out = jnp.maximum(out, 0.0)
        o_ref[...] = out.astype(o_ref.dtype)


def _round_up(x, m):
    return ((x + m - 1) // m) * m


def fused_matmul(x, w, scale, bias, *, relu, out_dtype=jnp.float32,
                 tm=256, tn=128, tk=512):
    """relu_opt((x @ w) * scale + bias); scale/bias broadcast over rows.

    bf16 MXU operands, f32 accumulation in a VMEM scratch, f32 epilogue.
    All dims are zero-padded up to tile multiples and sliced back, so the
    result is numerically identical to the unpadded op.
    """
    M, K = x.shape
    Kw, N = w.shape
    assert Kw == K

    # Adaptive tiles: small problems collapse to a single lane/sublane-aligned
    # block per axis; large M falls back to 256-row tiles (pipelined).
    m8 = _round_up(M, 8)
    tm = m8 if m8 <= 512 else tm
    tk = min(tk, _round_up(K, 128))
    tn = min(tn, _round_up(N, 128))
    Mp, Kp, Np = _round_up(M, tm), _round_up(K, tk), _round_up(N, tn)

    x_p = jnp.pad(x.astype(jnp.bfloat16), ((0, Mp - M), (0, Kp - K)))
    w_p = jnp.pad(w.astype(jnp.bfloat16), ((0, Kp - K), (0, Np - N)))
    scale_p = jnp.pad(jnp.asarray(scale, jnp.float32).reshape(1, N),
                      ((0, 0), (0, Np - N)))
    bias_p = jnp.pad(jnp.asarray(bias, jnp.float32).reshape(1, N),
                     ((0, 0), (0, Np - N)))

    grid = (Mp // tm, Np // tn, Kp // tk)
    kernel = functools.partial(_fused_matmul_kernel, relu=relu)

    out = pl.pallas_call(
        kernel,
        out_shape=jax.ShapeDtypeStruct((Mp, Np), out_dtype),
        grid_spec=pltpu.PrefetchScalarGridSpec(
            num_scalar_prefetch=0,
            grid=grid,
            in_specs=[
                pl.BlockSpec((tm, tk), lambda i, j, k: (i, k)),
                pl.BlockSpec((tk, tn), lambda i, j, k: (k, j)),
                pl.BlockSpec((1, tn), lambda i, j, k: (0, j)),
                pl.BlockSpec((1, tn), lambda i, j, k: (0, j)),
            ],
            out_specs=pl.BlockSpec((tm, tn), lambda i, j, k: (i, j)),
            scratch_shapes=[pltpu.VMEM((tm, tn), jnp.float32)],
        ),
        compiler_params=pltpu.CompilerParams(
            dimension_semantics=("parallel", "parallel", "arbitrary"),
            vmem_limit_bytes=32 * 1024 * 1024,
        ),
        cost_estimate=pl.CostEstimate(
            flops=2 * Mp * Np * Kp,
            transcendentals=0,
            bytes_accessed=(Mp * Kp + Kp * Np) * 2
            + Mp * Np * jnp.dtype(out_dtype).itemsize,
        ),
    )(x_p, w_p, scale_p, bias_p)
    return out[:M, :N]


# ------------------------------- JAX glue -----------------------------------

def im2col(x_nhwc, kh, kw, stride, pad):
    """(B*OH*OW, KH*KW*C) patches in (kh, kw, cin) order (no 6-D transpose)."""
    B, H, W, C = x_nhwc.shape
    xp = jnp.pad(x_nhwc, ((0, 0), (pad, pad), (pad, pad), (0, 0)))
    OH = (H + 2 * pad - kh) // stride + 1
    OW = (W + 2 * pad - kw) // stride + 1
    taps = []
    for i in range(kh):
        for j in range(kw):
            taps.append(
                xp[:, i:i + stride * OH:stride, j:j + stride * OW:stride, :])
    patches = jnp.concatenate(taps, axis=-1)        # (B, OH, OW, KH*KW*C)
    return patches.reshape(B * OH * OW, kh * kw * C), OH, OW


def prepare_params(p, eps=1e-5):
    """One-time re-layout of PyTorch-format params for the Pallas kernels:
    - conv weights (Cout,Cin,KH,KW) -> (KH*KW*Cin, Cout) matching patch order,
    - BN folded into per-channel (scale, shift),
    - fc weight columns permuted from NCHW-flatten to NHWC-flatten order."""
    q = {}
    for l in (1, 2):
        w = p[f"w{l}"]
        Cout, Cin, KH, KW = w.shape
        q[f"wm{l}"] = jnp.transpose(w, (2, 3, 1, 0)).reshape(KH * KW * Cin, Cout)
        scale = p[f"g{l}"] / jnp.sqrt(p[f"v{l}"] + eps)
        q[f"scale{l}"] = scale
        q[f"shift{l}"] = p[f"beta{l}"] + (p[f"b{l}"] - p[f"m{l}"]) * scale
    fc_w = p["fc_w"].reshape(10, 128, 7, 7).transpose(0, 2, 3, 1)
    q["fc_wm"] = fc_w.reshape(10, 128 * 7 * 7).T     # (6272, 10), NHWC column order
    q["fc_b"] = p["fc_b"]
    return q


def cnn_forward(x_nchw, q):
    x = jnp.transpose(x_nchw, (0, 2, 3, 1))          # NCHW -> NHWC (once, at input)
    B = x.shape[0]

    # conv1 + BN + ReLU  (im2col matmul fused with BN affine + ReLU, bf16 out)
    p1, OH1, OW1 = im2col(x, 4, 4, stride=2, pad=1)
    h1 = fused_matmul(p1, q["wm1"], q["scale1"], q["shift1"], relu=True,
                      out_dtype=jnp.bfloat16)
    h1 = h1.reshape(B, OH1, OW1, 64)

    # conv2 + BN + ReLU
    p2, OH2, OW2 = im2col(h1, 4, 4, stride=2, pad=1)
    h2 = fused_matmul(p2, q["wm2"], q["scale2"], q["shift2"], relu=True,
                      out_dtype=jnp.bfloat16)

    # FC: flatten directly in NHWC order (fc weight was permuted to match);
    # K is tiled (tk=896 divides 6272 exactly), M padded 2 -> 8 inside.
    feat = h2.reshape(B, OH2 * OW2 * 128)
    ones = jnp.ones((10,), jnp.float32)
    return fused_matmul(feat, q["fc_wm"], ones, q["fc_b"], relu=False,
                        out_dtype=jnp.float32, tk=896)


# ----------------------- reference (pure JAX, f32) ---------------------------

def reference_forward(x_nchw, p, eps=1e-5):
    def conv_bn_relu(x, w, b, g, beta, m, v):
        y = jax.lax.conv_general_dilated(
            x, w, window_strides=(2, 2), padding=((1, 1), (1, 1)),
            dimension_numbers=("NCHW", "OIHW", "NCHW"))
        y = y + b.reshape(1, -1, 1, 1)
        y = (g.reshape(1, -1, 1, 1) * (y - m.reshape(1, -1, 1, 1))
             / jnp.sqrt(v.reshape(1, -1, 1, 1) + eps) + beta.reshape(1, -1, 1, 1))
        return jnp.maximum(y, 0.0)

    h = conv_bn_relu(x_nchw, p["w1"], p["b1"], p["g1"], p["beta1"], p["m1"], p["v1"])
    h = conv_bn_relu(h, p["w2"], p["b2"], p["g2"], p["beta2"], p["m2"], p["v2"])
    z = h.reshape(h.shape[0], -1)                    # NCHW flatten (PyTorch .view)
    return z @ p["fc_w"].T + p["fc_b"]


# --------------------------------- params ------------------------------------

def init_params(channels):
    key = jax.random.PRNGKey(0)
    ks = jax.random.split(key, 6)
    p = {}
    p["w1"] = 0.05 * jax.random.normal(ks[0], (64, channels, 4, 4), jnp.float32)
    p["b1"] = 0.01 * jax.random.normal(ks[1], (64,), jnp.float32)
    p["g1"] = 1.0 + 0.01 * jnp.arange(64, dtype=jnp.float32)
    p["beta1"] = 0.01 * jnp.arange(64, dtype=jnp.float32)
    p["m1"] = jnp.zeros((64,), jnp.float32)
    p["v1"] = jnp.ones((64,), jnp.float32)

    p["w2"] = 0.02 * jax.random.normal(ks[2], (128, 64, 4, 4), jnp.float32)
    p["b2"] = 0.01 * jax.random.normal(ks[3], (128,), jnp.float32)
    p["g2"] = 1.0 + 0.005 * jnp.arange(128, dtype=jnp.float32)
    p["beta2"] = 0.005 * jnp.arange(128, dtype=jnp.float32)
    p["m2"] = jnp.zeros((128,), jnp.float32)
    p["v2"] = jnp.ones((128,), jnp.float32)

    p["fc_w"] = 0.01 * jax.random.normal(ks[4], (10, 128 * 7 * 7), jnp.float32)
    p["fc_b"] = 0.01 * jax.random.normal(ks[5], (10,), jnp.float32)
    return p


if __name__ == "__main__":
    channels = 1                      # args.channels; 28x28 input -> 128*7*7 features
    batch = 2
    params = init_params(channels)
    kparams = prepare_params(params)
    x = jax.random.normal(jax.random.PRNGKey(0), (batch, channels, 28, 28),
                          jnp.float32)

    out = cnn_forward(x, kparams)
    jax.block_until_ready(out)
    assert out.shape == (batch, 10), out.shape

    ref = reference_forward(x, params)
    assert bool(jnp.all(jnp.isfinite(out)))
    # Loose tolerance: kernel path uses bf16 MXU operands / bf16 activations.
    assert bool(jnp.allclose(out, ref, atol=0.1)), (out, ref)
    print("KERNEL_OK")
</pallas_src>

<mosaic_0001>
module attributes {stable_mosaic.version = 11 : i64} {
  func.func @_fused_matmul_kernel(%arg0: i32, %arg1: i32, %arg2: i32, %arg3: memref<392x128xbf16, #tpu.memory_space<vmem>>, %arg4: memref<128x128xbf16, #tpu.memory_space<vmem>>, %arg5: memref<1x128xf32, #tpu.memory_space<vmem>>, %arg6: memref<1x128xf32, #tpu.memory_space<vmem>>, %arg7: memref<392x128xbf16, #tpu.memory_space<vmem>>, %arg8: memref<392x128xf32, #tpu.memory_space<vmem>>) attributes {dimension_semantics = [#tpu.dimension_semantics<parallel>, #tpu.dimension_semantics<parallel>, #tpu.dimension_semantics<arbitrary>], iteration_bounds = array<i64: 1, 1, 1>, scalar_prefetch = 0 : i64, scratch_operands = 1 : i64, tpu.core_type = #tpu.core_type<tc>, window_params = [{transform_indices = @transform_0, window_bounds = array<i64: 392, 128>}, {transform_indices = @transform_1, window_bounds = array<i64: 128, 128>}, {transform_indices = @transform_2, window_bounds = array<i64: 1, 128>}, {transform_indices = @transform_3, window_bounds = array<i64: 1, 128>}, {transform_indices = @transform_4, window_bounds = array<i64: 392, 128>}]} {
    %c0_i32 = arith.constant 0 : i32
    %0 = arith.cmpi eq, %arg2, %c0_i32 : i32
    %1 = arith.extui %0 : i1 to i32
    %c0_i32_0 = arith.constant 0 : i32
    %2 = arith.cmpi ne, %1, %c0_i32_0 : i32
    scf.if %2 {
      %cst_10 = arith.constant 0.000000e+00 : f32
      %12 = vector.broadcast %cst_10 : f32 to vector<392x128xf32>
      %c0_11 = arith.constant 0 : index
      %c0_12 = arith.constant 0 : index
      %13 = vector.load %arg8[%c0_11, %c0_12] : memref<392x128xf32, #tpu.memory_space<vmem>>, vector<392x128xf32>
      tpu.vector_store %arg8[%c0_11, %c0_12], %12 {strides = array<i32>} : memref<392x128xf32, #tpu.memory_space<vmem>>, vector<392x128xf32>,
    } else {
    }
    %c0 = arith.constant 0 : index
    %c0_1 = arith.constant 0 : index
    %3 = vector.load %arg8[%c0, %c0_1] : memref<392x128xf32, #tpu.memory_space<vmem>>, vector<392x128xf32>
    %c0_2 = arith.constant 0 : index
    %c0_3 = arith.constant 0 : index
    %4 = vector.load %arg3[%c0_2, %c0_3] : memref<392x128xbf16, #tpu.memory_space<vmem>>, vector<392x128xbf16>
    %c0_4 = arith.constant 0 : index
    %c0_5 = arith.constant 0 : index
    %5 = vector.load %arg4[%c0_4, %c0_5] : memref<128x128xbf16, #tpu.memory_space<vmem>>, vector<128x128xbf16>
    %cst = arith.constant dense<0.000000e+00> : vector<392x128xf32>
    %6 = tpu.matmul %4, %5, %cst {dimension_numbers = #tpu.dot_dimension_numbers<[1], [0], [0], [1], [0, 0, 1, 1], [], []>} : vector<392x128xbf16>, vector<128x128xbf16>, vector<392x128xf32> -> vector<392x128xf32>
    %7 = arith.addf %3, %6 : vector<392x128xf32>
    %c0_6 = arith.constant 0 : index
    %c0_7 = arith.constant 0 : index
    %8 = vector.load %arg8[%c0_6, %c0_7] : memref<392x128xf32, #tpu.memory_space<vmem>>, vector<392x128xf32>
    tpu.vector_store %arg8[%c0_6, %c0_7], %7 {strides = array<i32>} : memref<392x128xf32, #tpu.memory_space<vmem>>, vector<392x128xf32>,
    %c0_i32_8 = arith.constant 0 : i32
    %9 = arith.cmpi eq, %arg2, %c0_i32_8 : i32
    %10 = arith.extui %9 : i1 to i32
    %c0_i32_9 = arith.constant 0 : i32
    %11 = arith.cmpi ne, %10, %c0_i32_9 : i32
    scf.if %11 {
      %c0_10 = arith.constant 0 : index
      %c0_11 = arith.constant 0 : index
      %12 = vector.load %arg8[%c0_10, %c0_11] : memref<392x128xf32, #tpu.memory_space<vmem>>, vector<392x128xf32>
      %c0_12 = arith.constant 0 : index
      %c0_13 = arith.constant 0 : index
      %13 = vector.load %arg5[%c0_12, %c0_13] : memref<1x128xf32, #tpu.memory_space<vmem>>, vector<1x128xf32>
      %14 = vector.broadcast %13 : vector<1x128xf32> to vector<392x128xf32>
      %15 = arith.mulf %12, %14 : vector<392x128xf32>
      %c0_14 = arith.constant 0 : index
      %c0_15 = arith.constant 0 : index
      %16 = vector.load %arg6[%c0_14, %c0_15] : memref<1x128xf32, #tpu.memory_space<vmem>>, vector<1x128xf32>
      %17 = vector.broadcast %16 : vector<1x128xf32> to vector<392x128xf32>
      %18 = arith.addf %15, %17 : vector<392x128xf32>
      %cst_16 = arith.constant 0.000000e+00 : f32
      %19 = vector.broadcast %cst_16 : f32 to vector<392x128xf32>
      %20 = arith.maximumf %18, %19 : vector<392x128xf32>
      %21 = arith.truncf %20 : vector<392x128xf32> to vector<392x128xbf16>
      %c0_17 = arith.constant 0 : index
      %c0_18 = arith.constant 0 : index
      %22 = vector.load %arg7[%c0_17, %c0_18] : memref<392x128xbf16, #tpu.memory_space<vmem>>, vector<392x128xbf16>
      tpu.vector_store %arg7[%c0_17, %c0_18], %21 {strides = array<i32>} : memref<392x128xbf16, #tpu.memory_space<vmem>>, vector<392x128xbf16>,
    } else {
    }
    return
  }
  func.func @transform_0(%arg0: i32, %arg1: i32, %arg2: i32) -> (i32, i32) {
    %c0_i32 = arith.constant 0 : i32
    return %arg0, %arg2 : i32, i32
  }
  func.func @transform_1(%arg0: i32, %arg1: i32, %arg2: i32) -> (i32, i32) {
    %c0_i32 = arith.constant 0 : i32
    return %arg2, %arg1 : i32, i32
  }
  func.func @transform_2(%arg0: i32, %arg1: i32, %arg2: i32) -> (i32, i32) {
    %c0_i32 = arith.constant 0 : i32
    %c0_i32_0 = arith.constant 0 : i32
    return %c0_i32, %arg1 : i32, i32
  }
  func.func @transform_3(%arg0: i32, %arg1: i32, %arg2: i32) -> (i32, i32) {
    %c0_i32 = arith.constant 0 : i32
    %c0_i32_0 = arith.constant 0 : i32
    return %c0_i32, %arg1 : i32, i32
  }
  func.func @transform_4(%arg0: i32, %arg1: i32, %arg2: i32) -> (i32, i32) {
    %c0_i32 = arith.constant 0 : i32
    return %arg0, %arg1 : i32, i32
  }
}

</mosaic_0001>

<bundles_post_ra>
// kernel: tpu_custom_call.1
= control target key start
LH: loop header
LB: loop body
LE: loop exit
PB: predicated region body
PF: predicated region fallthrough
CT: control target
= control target key end

     0   :  { %9 = vsyncpa [#allocation4], 0  ;;  %s2021_s0 = inlined_call_operand.hbm [shape: bf16[392,128], index: 0, kind: input, shape index: {}]   ;;  %s2022_s1 = inlined_call_operand.hbm [shape: bf16[128,128], index: 1, kind: input, shape index: {}]   ;;  %s2023_s2 = inlined_call_operand.vmem [shape: f32[1,128], index: 2, kind: input, shape index: {}]   ;;  %s2024_s3 = inlined_call_operand.vmem [shape: f32[1,128], index: 3, kind: input, shape index: {}]   ;;  %s2025_s4 = inlined_call_operand.hbm [shape: bf16[392,128], index: 4, kind: output, shape index: {}]  }
   0x1   :  { %10 = vsyncpa [#allocation7], 0 }
   0x2   :  { %11 = vsyncpa [#allocation5], 0  ;;  %s1770_s15 = smov [#allocation3]   ;;  %s1698_s19 = scalar_lea.hbm %s2021_s0, 3136 }
   0x3   :  { %s17_s16 = sshll.u32 %s1770_s15, 4  ;;  %p1699_p0 = scmp.ne.s32.totalorder %s2021_s0, %s1698_s19  ;;  %s18_s16 = int_to_ptr.vmem [resolvable:$true] %s17_s16 }
   0x4   :  { %p1702_p1 = scmp.lt.u32.totalorder %s1698_s19, %s2021_s0 }
   0x6   :  { %p1704_p2 = pnand %p1702_p1, %p1699_p0 }
   0x8   :  { %1707 = shalt.err (!%p1704_p2)
}
   0x9   :  { %s1708_s24 = scalar_lea.vmem %s18_s16, 3136  ;;  %p1713_p4 = scmp.lt.s32.totalorder %s18_s16, %s18_s16 }
   0xa   :  { %p1709_p3 = scmp.ne.s32.totalorder %s18_s16, %s1708_s24  ;;  %p1714_p5 = scmp.lt.s32.totalorder %s1708_s24, %s1708_s24 }
   0xc   :  { %p1715_p6 = por %p1714_p5, %p1713_p4 }
   0xe   :  { %p1716_p7 = pnand %p1715_p6, %p1709_p3 }
  0x10   :  { %1719 = shalt.err (!%p1716_p7)
}
  0x11   :  { %s1771_s25 = smov 64   ;;  %s1772_s26 = smov 4  }
  0x12   :  { %23 = dma.hbm_to_vmem [thread:$0]  %s2021_s0, 3136, %s18_s16, [#allocation4], %s1771_s25, %s1771_s25, %s1772_s26  }
  0x13   :  { %s1773_s29 = smov [#allocation6]   ;;  %s1720_s7 = scalar_lea.hbm %s2022_s1, 1024 }
  0x14   :  { %s29_s30 = sshll.u32 %s1773_s29, 4  ;;  %p1721_p8 = scmp.ne.s32.totalorder %s2022_s1, %s1720_s7  ;;  %s30_s30 = int_to_ptr.vmem [resolvable:$true] %s29_s30 }
  0x15   :  { %p1724_p9 = scmp.lt.u32.totalorder %s1720_s7, %s2022_s1 }
  0x17   :  { %p1726_p10 = pnand %p1724_p9, %p1721_p8 }
  0x19   :  { %1729 = shalt.err (!%p1726_p10)
}
  0x1a   :  { %s1730_s12 = scalar_lea.vmem %s30_s30, 1024  ;;  %p1735_p12 = scmp.lt.s32.totalorder %s30_s30, %s30_s30 }
  0x1b   :  { %p1731_p11 = scmp.ne.s32.totalorder %s30_s30, %s1730_s12  ;;  %p1736_p13 = scmp.lt.s32.totalorder %s1730_s12, %s1730_s12 }
  0x1d   :  { %p1737_p0 = por %p1736_p13, %p1735_p12 }
  0x1f   :  { %p1738_p1 = pnand %p1737_p0, %p1731_p11 }
  0x21   :  { %1741 = shalt.err (!%p1738_p1)
}
  0x22   :  { %35 = dma.hbm_to_vmem [thread:$0]  %s2022_s1, 1024, %s30_s30, [#allocation7], %s1771_s25, %s1771_s25, %s1772_s26  }
  0x23   :  { %1764 = dma.done.wait [#allocation4], 3136  }
  0x24   :  { %1765 = vsyncadd [#allocation4], 4294964160 }
  0x25   :  { %1766 = dma.done.wait [#allocation7], 1024  }
  0x26   :  { %1767 = vsyncadd [#allocation7], 4294966272  ;;  %v1774_v0 = vmov 0.0   ;;  %vm1775_vm0 = vmmov 0   ;;  %v1665_v1 = vld [vmem:[#allocation6] sm:$0xff]   ;;  %v1666_v2 = vld [vmem:[#allocation6 + $0x8] sm:$0xff]  }
  0x27   :  { %1526 = vmatprep.subr.bf16.mxu0 %v1774_v0  ;;  %1642 = vmatprep.subr.bf16.mxu1 %v1774_v0  ;;  %v1667_v3 = vld [vmem:[#allocation6 + $0x10] sm:$0xff]   ;;  %v1668_v4 = vld [vmem:[#allocation6 + $0x18] sm:$0xff]   ;;  %v1669_v5 = vld [vmem:[#allocation6 + $0x20] sm:$0xff]  }
  0x28   :  { %1542 = vmatprep.mubr.msk.bf16.mxu0 %vm1775_vm0, %v1774_v0  ;;  %1594 = vmatprep.mubr.msk.bf16.mxu1 %vm1775_vm0, %v1774_v0  ;;  %v1670_v6 = vld [vmem:[#allocation6 + $0x28] sm:$0xff]   ;;  %v1671_v7 = vld [vmem:[#allocation6 + $0x30] sm:$0xff]   ;;  %v1672_v8 = vld [vmem:[#allocation6 + $0x38] sm:$0xff]  }
  0x29   :  { %1527 = vmatpush3.bf16.msra.mxu0 %v1665_v1  ;;  %1650 = vmatpush3.bf16.msra.mxu1 %v1665_v1  ;;  %v1673_v9 = vld [vmem:[#allocation3] sm:$0xff]   ;;  %v1674_v10 = vld [vmem:[#allocation3 + $0x68] sm:$0xff]   ;;  %v1676_v12 = vld [vmem:[#allocation3 + $0x70] sm:$0xff]  }
  0x2a   :  { %1528 = vmatprep.subr.bf16.mxu0 %v1774_v0  ;;  %1643 = vmatprep.subr.bf16.mxu1 %v1774_v0  ;;  %v1675_v11 = vld [vmem:[#allocation3 + $0x8] sm:$0xff]   ;;  %v1677_v13 = vld [vmem:[#allocation3 + $0x10] sm:$0xff]   ;;  %v1678_v14 = vld [vmem:[#allocation3 + $0x78] sm:$0xff]  }
  0x2b   :  { %v1679_v15 = vld [vmem:[#allocation3 + $0x18] sm:$0xff]   ;;  %v1680_v16 = vld [vmem:[#allocation3 + $0x80] sm:$0xff]   ;;  %v1682_v18 = vld [vmem:[#allocation3 + $0x88] sm:$0xff]  }
  0x2c   :  { %v1681_v17 = vld [vmem:[#allocation3 + $0x20] sm:$0xff]   ;;  %v1683_v19 = vld [vmem:[#allocation3 + $0x28] sm:$0xff]   ;;  %v1684_v20 = vld [vmem:[#allocation3 + $0x90] sm:$0xff]  }
  0x2d   :  { %1529 = vmatpush3.bf16.msra.mxu0 %v1666_v2  ;;  %1651 = vmatpush3.bf16.msra.mxu1 %v1666_v2  ;;  %v1685_v21 = vld [vmem:[#allocation3 + $0x30] sm:$0xff]   ;;  %v1686_v22 = vld [vmem:[#allocation3 + $0x98] sm:$0xff]   ;;  %v1688_v24 = vld [vmem:[#allocation3 + $0xa0] sm:$0xff]  }
  0x2e   :  { %1530 = vmatprep.subr.bf16.mxu0 %v1774_v0  ;;  %1644 = vmatprep.subr.bf16.mxu1 %v1774_v0  ;;  %v1687_v23 = vld [vmem:[#allocation3 + $0x38] sm:$0xff]   ;;  %v1689_v25 = vld [vmem:[#allocation3 + $0x40] sm:$0xff]   ;;  %v1690_v26 = vld [vmem:[#allocation3 + $0xa8] sm:$0xff]  }
  0x2f   :  { %v1691_v27 = vld [vmem:[#allocation3 + $0x48] sm:$0xff]   ;;  %v1692_v28 = vld [vmem:[#allocation3 + $0xb0] sm:$0xff]   ;;  %v1694_v30 = vld [vmem:[#allocation3 + $0xb8] sm:$0xff]  }
  0x30   :  { %v1693_v29 = vld [vmem:[#allocation3 + $0x50] sm:$0xff]   ;;  %v1695_v31 = vld [vmem:[#allocation3 + $0x58] sm:$0xff]   ;;  %v1696_v32 = vld [vmem:[#allocation3 + $0xc0] ss:$0 sps:$4 sm:$0xff]  }
  0x31   :  { %1531 = vmatpush3.bf16.msra.mxu0 %v1667_v3  ;;  %1652 = vmatpush3.bf16.msra.mxu1 %v1667_v3  ;;  %v1697_v33 = vld [vmem:[#allocation3 + $0x60] sm:$0xff]  }
  0x32   :  { %1532 = vmatprep.subr.bf16.mxu0 %v1774_v0  ;;  %1645 = vmatprep.subr.bf16.mxu1 %v1774_v0  ;;  %v1901_v34 = vld [vmem:[%s2023_s2] ss:$0 sm:$0xff]  ;;  %s1776_s2 = smov [#allocation8]  }
  0x33   :  { %v1906_v36 = vld [vmem:[%s2024_s3] ss:$0 sm:$0xff]  ;;  %s1204_s3 = sshll.u32 %s1776_s2, 4  ;;  %s1205_s3 = int_to_ptr.vmem [resolvable:$true] %s1204_s3 }
  0x34   :  { %s1742_s17 = scalar_lea.vmem %s1205_s3, 3136  ;;  %p1747_p3 = scmp.lt.s32.totalorder %s1205_s3, %s1205_s3 }
  0x35   :  { %1533 = vmatpush3.bf16.msra.mxu0 %v1668_v4  ;;  %1653 = vmatpush3.bf16.msra.mxu1 %v1668_v4  ;;  %p1743_p2 = scmp.ne.s32.totalorder %s1205_s3, %s1742_s17  ;;  %p1748_p4 = scmp.lt.s32.totalorder %s1742_s17, %s1742_s17 }
  0x36   :  { %1534 = vmatprep.subr.bf16.mxu0 %v1774_v0  ;;  %1646 = vmatprep.subr.bf16.mxu1 %v1774_v0 }
  0x37   :  { %p1749_p5 = por %p1748_p4, %p1747_p3 }
  0x39   :  { %1535 = vmatpush3.bf16.msra.mxu0 %v1669_v5  ;;  %1654 = vmatpush3.bf16.msra.mxu1 %v1669_v5  ;;  %p1750_p6 = pnand %p1749_p5, %p1743_p2 }
  0x3a   :  { %1536 = vmatprep.subr.bf16.mxu0 %v1774_v0  ;;  %1647 = vmatprep.subr.bf16.mxu1 %v1774_v0 }
  0x3d   :  { %1537 = vmatpush3.bf16.msra.mxu0 %v1670_v6  ;;  %1655 = vmatpush3.bf16.msra.mxu1 %v1670_v6 }
  0x3e   :  { %1538 = vmatprep.subr.bf16.mxu0 %v1774_v0  ;;  %1648 = vmatprep.subr.bf16.mxu1 %v1774_v0 }
  0x41   :  { %1539 = vmatpush3.bf16.msra.mxu0 %v1671_v7  ;;  %1656 = vmatpush3.bf16.msra.mxu1 %v1671_v7 }
  0x42   :  { %1540 = vmatprep.subr.bf16.mxu0 %v1774_v0  ;;  %1649 = vmatprep.subr.bf16.mxu1 %v1774_v0 }
  0x45   :  { %1541 = vmatpush3.bf16.msra.mxu0 %v1672_v8  ;;  %1657 = vmatpush3.bf16.msra.mxu1 %v1672_v8 }
  0x48   :  { %1543 = vmatmul.mubr.bf16.vlgmr.msra.gmra.mrb[0].mxu0 %v1673_v9  ;;  %1595 = vmatmul.mubr.bf16.vlgmr.msra.gmra.mrb[0].mxu1 %v1674_v10 }
  0x49   :  { %1546 = vmatprep.mubr.msk.bf16.mxu0 %vm1775_vm0, %v1774_v0  ;;  %1598 = vmatprep.mubr.msk.bf16.mxu1 %vm1775_vm0, %v1774_v0 }
  0x50   :  { %1547 = vmatmul.mubr.bf16.gmra.mrb[4].mxu0 %v1675_v11  ;;  %1599 = vmatmul.mubr.bf16.gmra.mrb[4].mxu1 %v1676_v12 }
  0x51   :  { %1550 = vmatprep.mubr.msk.bf16.mxu0 %vm1775_vm0, %v1774_v0  ;;  %1602 = vmatprep.mubr.msk.bf16.mxu1 %vm1775_vm0, %v1774_v0 }
  0x58   :  { %1551 = vmatmul.mubr.bf16.gmra.mrb[8].mxu0 %v1677_v13  ;;  %1603 = vmatmul.mubr.bf16.gmra.mrb[8].mxu1 %v1678_v14 }
  0x59   :  { %1554 = vmatprep.mubr.msk.bf16.mxu0 %vm1775_vm0, %v1774_v0  ;;  %1606 = vmatprep.mubr.msk.bf16.mxu1 %vm1775_vm0, %v1774_v0 }
  0x60   :  { %1555 = vmatmul.mubr.bf16.gmra.mrb[12].mxu0 %v1679_v15  ;;  %1607 = vmatmul.mubr.bf16.gmra.mrb[12].mxu1 %v1680_v16 }
  0x61   :  { %1558 = vmatprep.mubr.msk.bf16.mxu0 %vm1775_vm0, %v1774_v0  ;;  %1610 = vmatprep.mubr.msk.bf16.mxu1 %vm1775_vm0, %v1774_v0 }
  0x68   :  { %1559 = vmatmul.mubr.bf16.gmra.mrb[16].mxu0 %v1681_v17  ;;  %1611 = vmatmul.mubr.bf16.gmra.mrb[16].mxu1 %v1682_v18 }
  0x69   :  { %1562 = vmatprep.mubr.msk.bf16.mxu0 %vm1775_vm0, %v1774_v0  ;;  %1614 = vmatprep.mubr.msk.bf16.mxu1 %vm1775_vm0, %v1774_v0 }
  0x70   :  { %1563 = vmatmul.mubr.bf16.gmra.mrb[20].mxu0 %v1683_v19  ;;  %1615 = vmatmul.mubr.bf16.gmra.mrb[20].mxu1 %v1684_v20 }
  0x71   :  { %1566 = vmatprep.mubr.msk.bf16.mxu0 %vm1775_vm0, %v1774_v0  ;;  %1618 = vmatprep.mubr.msk.bf16.mxu1 %vm1775_vm0, %v1774_v0 }
  0x78   :  { %1567 = vmatmul.mubr.bf16.gmra.mrb[24].mxu0 %v1685_v21  ;;  %1619 = vmatmul.mubr.bf16.gmra.mrb[24].mxu1 %v1686_v22 }
  0x79   :  { %1570 = vmatprep.mubr.msk.bf16.mxu0 %vm1775_vm0, %v1774_v0  ;;  %1622 = vmatprep.mubr.msk.bf16.mxu1 %vm1775_vm0, %v1774_v0 }
  0x80   :  { %1571 = vmatmul.mubr.bf16.gmra.mrb[28].mxu0 %v1687_v23  ;;  %1623 = vmatmul.mubr.bf16.gmra.mrb[28].mxu1 %v1688_v24 }
  0x81   :  { %1574 = vmatprep.mubr.msk.bf16.mxu0 %vm1775_vm0, %v1774_v0  ;;  %1626 = vmatprep.mubr.msk.bf16.mxu1 %vm1775_vm0, %v1774_v0 }
  0x88   :  { %1575 = vmatmul.mubr.bf16.gmra.mrb[32].mxu0 %v1689_v25  ;;  %1627 = vmatmul.mubr.bf16.gmra.mrb[32].mxu1 %v1690_v26 }
  0x89   :  { %1578 = vmatprep.mubr.msk.bf16.mxu0 %vm1775_vm0, %v1774_v0  ;;  %1630 = vmatprep.mubr.msk.bf16.mxu1 %vm1775_vm0, %v1774_v0 }
  0x90   :  { %1579 = vmatmul.mubr.bf16.gmra.mrb[36].mxu0 %v1691_v27  ;;  %1631 = vmatmul.mubr.bf16.gmra.mrb[36].mxu1 %v1692_v28 }
  0x91   :  { %1582 = vmatprep.mubr.msk.bf16.mxu0 %vm1775_vm0, %v1774_v0  ;;  %1634 = vmatprep.mubr.msk.bf16.mxu1 %vm1775_vm0, %v1774_v0 }
  0x98   :  { %1583 = vmatmul.mubr.bf16.gmra.mrb[40].mxu0 %v1693_v29  ;;  %1635 = vmatmul.mubr.bf16.gmra.mrb[40].mxu1 %v1694_v30 }
  0x99   :  { %1586 = vmatprep.mubr.msk.bf16.mxu0 %vm1775_vm0, %v1774_v0  ;;  %1638 = vmatprep.mubr.msk.bf16.mxu1 %vm1775_vm0, %v1774_v0 }
  0xa0   :  { %1587 = vmatmul.mubr.bf16.gmra.mrb[44].mxu0 %v1695_v31  ;;  %1639 = vmatmul.mubr.bf16.gmra.mrb[44].mxu1 %v1696_v32 }
  0xa1   :  { %1590 = vmatprep.mubr.msk.bf16.mxu0 %vm1775_vm0, %v1774_v0 }
  0xa8   :  { %1591 = vmatmul.mubr.bf16.gmra.mrb[48].mxu0 %v1697_v33 }
 0x11b   :  { %v444_v35 = vpop.f32.mrb[0].mxu0  ;;  %v548_v37 = vpop.f32.mrb[0].mxu1 }
 0x11c   :  { %v799_v38 = vmul.f32 %v1901_v34, %v444_v35  ;;  %v1544_v39 = vpop.f32.mrb[1].mxu0  ;;  %v825_v40 = vmul.f32 %v1901_v34, %v548_v37  ;;  %v1596_v41 = vpop.f32.mrb[1].mxu1 }
 0x11d   :  { %v447_v42 = vpop.f32.mrb[2].mxu0  ;;  %v551_v43 = vpop.f32.mrb[2].mxu1 }
 0x11e   :  { %v855_v44 = vadd.f32 %v1906_v36, %v799_v38  ;;  %v800_v45 = vmul.f32 %v1901_v34, %v447_v42  ;;  %v1545_v46 = vpop.f32.mrb[3].mxu0  ;;  %v881_v47 = vadd.f32 %v1906_v36, %v825_v40  ;;  %v826_v48 = vmul.f32 %v1901_v34, %v551_v43  ;;  %v1597_v49 = vpop.f32.mrb[3].mxu1 }
 0x120   :  { %v856_v50 = vadd.f32 %v1906_v36, %v800_v45  ;;  %v930_v51 = vmax.f32 %v881_v47, 0.0  ;;  %v882_v52 = vadd.f32 %v1906_v36, %v826_v48  ;;  %v904_v53 = vmax.f32 %v855_v44, 0.0 }
 0x122   :  { %v905_v54 = vmax.f32 %v856_v50, 0.0  ;;  %v931_v55 = vmax.f32 %v882_v52, 0.0 }
 0x123   :  { %v452_v56 = vpop.f32.mrb[4].mxu0  ;;  %v556_v57 = vpop.f32.mrb[4].mxu1 }
 0x124   :  { %v1353_v58 = vpack.c.bf16 %v905_v54, %v904_v53  ;;  %v801_v59 = vmul.f32 %v1901_v34, %v452_v56  ;;  %v1548_v60 = vpop.f32.mrb[5].mxu0  ;;  %v1418_v61 = vpack.c.bf16 %v931_v55, %v930_v51  ;;  %v827_v62 = vmul.f32 %v1901_v34, %v556_v57  ;;  %v1600_v63 = vpop.f32.mrb[5].mxu1 }
 0x125   :  { %v455_v0 = vpop.f32.mrb[6].mxu0  ;;  %v559_v1 = vpop.f32.mrb[6].mxu1 }
 0x126   :  { %1354 = vst [vmem:[#allocation8] sm:$0xff] %v1353_v58   ;;  %v857_v2 = vadd.f32 %v1906_v36, %v801_v59  ;;  %1482 = vst [vmem:[#allocation8 + $0x68] sm:$0xff] %v1418_v61   ;;  %v802_v3 = vmul.f32 %v1901_v34, %v455_v0  ;;  %v1549_v4 = vpop.f32.mrb[7].mxu0  ;;  %v883_v5 = vadd.f32 %v1906_v36, %v827_v62  ;;  %v1601_v7 = vpop.f32.mrb[7].mxu1 }
 0x127   :  { %v828_v6 = vmul.f32 %v1901_v34, %v559_v1 }
 0x128   :  { %v858_v8 = vadd.f32 %v1906_v36, %v802_v3  ;;  %v932_v9 = vmax.f32 %v883_v5, 0.0  ;;  %v906_v11 = vmax.f32 %v857_v2, 0.0 }
 0x129   :  { %v884_v10 = vadd.f32 %v1906_v36, %v828_v6 }
 0x12a   :  { %v907_v12 = vmax.f32 %v858_v8, 0.0 }
 0x12b   :  { %v933_v13 = vmax.f32 %v884_v10, 0.0  ;;  %v460_v14 = vpop.f32.mrb[8].mxu0  ;;  %v564_v15 = vpop.f32.mrb[8].mxu1 }
 0x12c   :  { %v1358_v16 = vpack.c.bf16 %v907_v12, %v906_v11  ;;  %v803_v17 = vmul.f32 %v1901_v34, %v460_v14  ;;  %v1552_v18 = vpop.f32.mrb[9].mxu0  ;;  %v829_v20 = vmul.f32 %v1901_v34, %v564_v15  ;;  %v1604_v21 = vpop.f32.mrb[9].mxu1 }
 0x12d   :  { %v1423_v19 = vpack.c.bf16 %v933_v13, %v932_v9  ;;  %v463_v22 = vpop.f32.mrb[10].mxu0  ;;  %v567_v23 = vpop.f32.mrb[10].mxu1 }
 0x12e   :  { %1470 = vst [vmem:[#allocation8 + $0x8] sm:$0xff] %v1358_v16   ;;  %v859_v24 = vadd.f32 %v1906_v36, %v803_v17  ;;  %v804_v25 = vmul.f32 %v1901_v34, %v463_v22  ;;  %v1553_v26 = vpop.f32.mrb[11].mxu0  ;;  %v885_v27 = vadd.f32 %v1906_v36, %v829_v20  ;;  %v830_v28 = vmul.f32 %v1901_v34, %v567_v23  ;;  %v1605_v29 = vpop.f32.mrb[11].mxu1 }
 0x12f   :  { %1483 = vst [vmem:[#allocation8 + $0x70] sm:$0xff] %v1423_v19  }
 0x130   :  { %v860_v30 = vadd.f32 %v1906_v36, %v804_v25  ;;  %v934_v31 = vmax.f32 %v885_v27, 0.0  ;;  %v886_v32 = vadd.f32 %v1906_v36, %v830_v28  ;;  %v908_v33 = vmax.f32 %v859_v24, 0.0 }
 0x132   :  { %v909_v35 = vmax.f32 %v860_v30, 0.0  ;;  %v935_v37 = vmax.f32 %v886_v32, 0.0 }
 0x133   :  { %v468_v38 = vpop.f32.mrb[12].mxu0  ;;  %v572_v39 = vpop.f32.mrb[12].mxu1 }
 0x134   :  { %v1363_v40 = vpack.c.bf16 %v909_v35, %v908_v33  ;;  %v805_v41 = vmul.f32 %v1901_v34, %v468_v38  ;;  %v1556_v42 = vpop.f32.mrb[13].mxu0  ;;  %v1428_v43 = vpack.c.bf16 %v935_v37, %v934_v31  ;;  %v831_v44 = vmul.f32 %v1901_v34, %v572_v39  ;;  %v1608_v45 = vpop.f32.mrb[13].mxu1 }
 0x135   :  { %v471_v46 = vpop.f32.mrb[14].mxu0  ;;  %v575_v47 = vpop.f32.mrb[14].mxu1 }
 0x136   :  { %1471 = vst [vmem:[#allocation8 + $0x10] sm:$0xff] %v1363_v40   ;;  %v861_v48 = vadd.f32 %v1906_v36, %v805_v41  ;;  %1484 = vst [vmem:[#allocation8 + $0x78] sm:$0xff] %v1428_v43   ;;  %v806_v49 = vmul.f32 %v1901_v34, %v471_v46  ;;  %v1557_v50 = vpop.f32.mrb[15].mxu0  ;;  %v887_v51 = vadd.f32 %v1906_v36, %v831_v44  ;;  %v1609_v53 = vpop.f32.mrb[15].mxu1 }
 0x137   :  { %v832_v52 = vmul.f32 %v1901_v34, %v575_v47 }
 0x138   :  { %v862_v54 = vadd.f32 %v1906_v36, %v806_v49  ;;  %v936_v55 = vmax.f32 %v887_v51, 0.0  ;;  %v910_v57 = vmax.f32 %v861_v48, 0.0 }
 0x139   :  { %v888_v56 = vadd.f32 %v1906_v36, %v832_v52 }
 0x13a   :  { %v911_v58 = vmax.f32 %v862_v54, 0.0 }
 0x13b   :  { %v937_v59 = vmax.f32 %v888_v56, 0.0  ;;  %v476_v60 = vpop.f32.mrb[16].mxu0  ;;  %v580_v61 = vpop.f32.mrb[16].mxu1 }
 0x13c   :  { %v1368_v62 = vpack.c.bf16 %v911_v58, %v910_v57  ;;  %v807_v63 = vmul.f32 %v1901_v34, %v476_v60  ;;  %v1560_v0 = vpop.f32.mrb[17].mxu0  ;;  %v833_v2 = vmul.f32 %v1901_v34, %v580_v61  ;;  %v1612_v3 = vpop.f32.mrb[17].mxu1 }
 0x13d   :  { %v1433_v1 = vpack.c.bf16 %v937_v59, %v936_v55  ;;  %v479_v4 = vpop.f32.mrb[18].mxu0  ;;  %v583_v5 = vpop.f32.mrb[18].mxu1 }
 0x13e   :  { %1472 = vst [vmem:[#allocation8 + $0x18] sm:$0xff] %v1368_v62   ;;  %v863_v6 = vadd.f32 %v1906_v36, %v807_v63  ;;  %v808_v7 = vmul.f32 %v1901_v34, %v479_v4  ;;  %v1561_v8 = vpop.f32.mrb[19].mxu0  ;;  %v889_v9 = vadd.f32 %v1906_v36, %v833_v2  ;;  %v834_v10 = vmul.f32 %v1901_v34, %v583_v5  ;;  %v1613_v11 = vpop.f32.mrb[19].mxu1 }
 0x13f   :  { %1485 = vst [vmem:[#allocation8 + $0x80] sm:$0xff] %v1433_v1  }
 0x140   :  { %v864_v12 = vadd.f32 %v1906_v36, %v808_v7  ;;  %v938_v13 = vmax.f32 %v889_v9, 0.0  ;;  %v890_v14 = vadd.f32 %v1906_v36, %v834_v10  ;;  %v912_v15 = vmax.f32 %v863_v6, 0.0 }
 0x142   :  { %v913_v16 = vmax.f32 %v864_v12, 0.0  ;;  %v939_v17 = vmax.f32 %v890_v14, 0.0 }
 0x143   :  { %v484_v18 = vpop.f32.mrb[20].mxu0  ;;  %v588_v19 = vpop.f32.mrb[20].mxu1 }
 0x144   :  { %v1373_v20 = vpack.c.bf16 %v913_v16, %v912_v15  ;;  %v809_v21 = vmul.f32 %v1901_v34, %v484_v18  ;;  %v1564_v22 = vpop.f32.mrb[21].mxu0  ;;  %v1438_v23 = vpack.c.bf16 %v939_v17, %v938_v13  ;;  %v835_v24 = vmul.f32 %v1901_v34, %v588_v19  ;;  %v1616_v25 = vpop.f32.mrb[21].mxu1 }
 0x145   :  { %v487_v26 = vpop.f32.mrb[22].mxu0  ;;  %v591_v27 = vpop.f32.mrb[22].mxu1 }
 0x146   :  { %1473 = vst [vmem:[#allocation8 + $0x20] sm:$0xff] %v1373_v20   ;;  %v865_v28 = vadd.f32 %v1906_v36, %v809_v21  ;;  %1486 = vst [vmem:[#allocation8 + $0x88] sm:$0xff] %v1438_v23   ;;  %v810_v29 = vmul.f32 %v1901_v34, %v487_v26  ;;  %v1565_v30 = vpop.f32.mrb[23].mxu0  ;;  %v891_v31 = vadd.f32 %v1906_v36, %v835_v24  ;;  %v1617_v33 = vpop.f32.mrb[23].mxu1 }
 0x147   :  { %v836_v32 = vmul.f32 %v1901_v34, %v591_v27 }
 0x148   :  { %v866_v35 = vadd.f32 %v1906_v36, %v810_v29  ;;  %v940_v37 = vmax.f32 %v891_v31, 0.0  ;;  %v914_v39 = vmax.f32 %v865_v28, 0.0 }
 0x149   :  { %v892_v38 = vadd.f32 %v1906_v36, %v836_v32 }
 0x14a   :  { %v915_v40 = vmax.f32 %v866_v35, 0.0 }
 0x14b   :  { %v941_v41 = vmax.f32 %v892_v38, 0.0  ;;  %v492_v42 = vpop.f32.mrb[24].mxu0  ;;  %v596_v43 = vpop.f32.mrb[24].mxu1 }
 0x14c   :  { %v1378_v44 = vpack.c.bf16 %v915_v40, %v914_v39  ;;  %v811_v45 = vmul.f32 %v1901_v34, %v492_v42  ;;  %v1568_v46 = vpop.f32.mrb[25].mxu0  ;;  %v837_v48 = vmul.f32 %v1901_v34, %v596_v43  ;;  %v1620_v49 = vpop.f32.mrb[25].mxu1 }
 0x14d   :  { %v1443_v47 = vpack.c.bf16 %v941_v41, %v940_v37  ;;  %v495_v50 = vpop.f32.mrb[26].mxu0  ;;  %v599_v51 = vpop.f32.mrb[26].mxu1 }
 0x14e   :  { %1474 = vst [vmem:[#allocation8 + $0x28] sm:$0xff] %v1378_v44   ;;  %v867_v52 = vadd.f32 %v1906_v36, %v811_v45  ;;  %v812_v53 = vmul.f32 %v1901_v34, %v495_v50  ;;  %v1569_v54 = vpop.f32.mrb[27].mxu0  ;;  %v893_v55 = vadd.f32 %v1906_v36, %v837_v48  ;;  %v838_v56 = vmul.f32 %v1901_v34, %v599_v51  ;;  %v1621_v57 = vpop.f32.mrb[27].mxu1 }
 0x14f   :  { %1487 = vst [vmem:[#allocation8 + $0x90] sm:$0xff] %v1443_v47  }
 0x150   :  { %v868_v58 = vadd.f32 %v1906_v36, %v812_v53  ;;  %v942_v59 = vmax.f32 %v893_v55, 0.0  ;;  %v894_v60 = vadd.f32 %v1906_v36, %v838_v56  ;;  %v916_v61 = vmax.f32 %v867_v52, 0.0 }
 0x152   :  { %v917_v62 = vmax.f32 %v868_v58, 0.0  ;;  %v943_v63 = vmax.f32 %v894_v60, 0.0 }
 0x153   :  { %v500_v0 = vpop.f32.mrb[28].mxu0  ;;  %v604_v1 = vpop.f32.mrb[28].mxu1 }
 0x154   :  { %v1383_v2 = vpack.c.bf16 %v917_v62, %v916_v61  ;;  %v813_v3 = vmul.f32 %v1901_v34, %v500_v0  ;;  %v1572_v4 = vpop.f32.mrb[29].mxu0  ;;  %v1448_v5 = vpack.c.bf16 %v943_v63, %v942_v59  ;;  %v839_v6 = vmul.f32 %v1901_v34, %v604_v1  ;;  %v1624_v7 = vpop.f32.mrb[29].mxu1 }
 0x155   :  { %v503_v8 = vpop.f32.mrb[30].mxu0  ;;  %v607_v9 = vpop.f32.mrb[30].mxu1 }
 0x156   :  { %1475 = vst [vmem:[#allocation8 + $0x30] sm:$0xff] %v1383_v2   ;;  %v869_v10 = vadd.f32 %v1906_v36, %v813_v3  ;;  %1488 = vst [vmem:[#allocation8 + $0x98] sm:$0xff] %v1448_v5   ;;  %v814_v11 = vmul.f32 %v1901_v34, %v503_v8  ;;  %v1573_v12 = vpop.f32.mrb[31].mxu0  ;;  %v895_v13 = vadd.f32 %v1906_v36, %v839_v6  ;;  %v1625_v15 = vpop.f32.mrb[31].mxu1 }
 0x157   :  { %v840_v14 = vmul.f32 %v1901_v34, %v607_v9 }
 0x158   :  { %v870_v16 = vadd.f32 %v1906_v36, %v814_v11  ;;  %v944_v17 = vmax.f32 %v895_v13, 0.0  ;;  %v918_v19 = vmax.f32 %v869_v10, 0.0 }
 0x159   :  { %v896_v18 = vadd.f32 %v1906_v36, %v840_v14 }
 0x15a   :  { %v919_v20 = vmax.f32 %v870_v16, 0.0 }
 0x15b   :  { %v945_v21 = vmax.f32 %v896_v18, 0.0  ;;  %v508_v22 = vpop.f32.mrb[32].mxu0  ;;  %v612_v23 = vpop.f32.mrb[32].mxu1 }
 0x15c   :  { %v1388_v24 = vpack.c.bf16 %v919_v20, %v918_v19  ;;  %v815_v25 = vmul.f32 %v1901_v34, %v508_v22  ;;  %v1576_v26 = vpop.f32.mrb[33].mxu0  ;;  %v841_v28 = vmul.f32 %v1901_v34, %v612_v23  ;;  %v1628_v29 = vpop.f32.mrb[33].mxu1 }
 0x15d   :  { %v1453_v27 = vpack.c.bf16 %v945_v21, %v944_v17  ;;  %v511_v30 = vpop.f32.mrb[34].mxu0  ;;  %v615_v31 = vpop.f32.mrb[34].mxu1 }
 0x15e   :  { %1476 = vst [vmem:[#allocation8 + $0x38] sm:$0xff] %v1388_v24   ;;  %v871_v32 = vadd.f32 %v1906_v36, %v815_v25  ;;  %v816_v33 = vmul.f32 %v1901_v34, %v511_v30  ;;  %v1577_v35 = vpop.f32.mrb[35].mxu0  ;;  %v897_v37 = vadd.f32 %v1906_v36, %v841_v28  ;;  %v842_v38 = vmul.f32 %v1901_v34, %v615_v31  ;;  %v1629_v39 = vpop.f32.mrb[35].mxu1 }
 0x15f   :  { %1489 = vst [vmem:[#allocation8 + $0xa0] sm:$0xff] %v1453_v27  }
 0x160   :  { %v872_v40 = vadd.f32 %v1906_v36, %v816_v33  ;;  %v946_v41 = vmax.f32 %v897_v37, 0.0  ;;  %v898_v42 = vadd.f32 %v1906_v36, %v842_v38  ;;  %v920_v43 = vmax.f32 %v871_v32, 0.0 }
 0x162   :  { %v921_v44 = vmax.f32 %v872_v40, 0.0  ;;  %v947_v45 = vmax.f32 %v898_v42, 0.0 }
 0x163   :  { %v516_v46 = vpop.f32.mrb[36].mxu0  ;;  %v620_v47 = vpop.f32.mrb[36].mxu1 }
 0x164   :  { %v1393_v48 = vpack.c.bf16 %v921_v44, %v920_v43  ;;  %v817_v49 = vmul.f32 %v1901_v34, %v516_v46  ;;  %v1580_v50 = vpop.f32.mrb[37].mxu0  ;;  %v1458_v51 = vpack.c.bf16 %v947_v45, %v946_v41  ;;  %v843_v52 = vmul.f32 %v1901_v34, %v620_v47  ;;  %v1632_v53 = vpop.f32.mrb[37].mxu1 }
 0x165   :  { %v519_v54 = vpop.f32.mrb[38].mxu0  ;;  %v623_v55 = vpop.f32.mrb[38].mxu1 }
 0x166   :  { %1477 = vst [vmem:[#allocation8 + $0x40] sm:$0xff] %v1393_v48   ;;  %v873_v56 = vadd.f32 %v1906_v36, %v817_v49  ;;  %1490 = vst [vmem:[#allocation8 + $0xa8] sm:$0xff] %v1458_v51   ;;  %v818_v57 = vmul.f32 %v1901_v34, %v519_v54  ;;  %v1581_v58 = vpop.f32.mrb[39].mxu0  ;;  %v899_v59 = vadd.f32 %v1906_v36, %v843_v52  ;;  %v1633_v61 = vpop.f32.mrb[39].mxu1 }
 0x167   :  { %v844_v60 = vmul.f32 %v1901_v34, %v623_v55 }
 0x168   :  { %v874_v62 = vadd.f32 %v1906_v36, %v818_v57  ;;  %v948_v63 = vmax.f32 %v899_v59, 0.0  ;;  %v922_v1 = vmax.f32 %v873_v56, 0.0 }
 0x169   :  { %v900_v0 = vadd.f32 %v1906_v36, %v844_v60 }
 0x16a   :  { %v923_v2 = vmax.f32 %v874_v62, 0.0 }
 0x16b   :  { %v949_v3 = vmax.f32 %v900_v0, 0.0  ;;  %v524_v4 = vpop.f32.mrb[40].mxu0  ;;  %v628_v5 = vpop.f32.mrb[40].mxu1 }
 0x16c   :  { %v1398_v6 = vpack.c.bf16 %v923_v2, %v922_v1  ;;  %v819_v7 = vmul.f32 %v1901_v34, %v524_v4  ;;  %v1584_v8 = vpop.f32.mrb[41].mxu0  ;;  %v845_v10 = vmul.f32 %v1901_v34, %v628_v5  ;;  %v1636_v11 = vpop.f32.mrb[41].mxu1 }
 0x16d   :  { %v1463_v9 = vpack.c.bf16 %v949_v3, %v948_v63  ;;  %v527_v12 = vpop.f32.mrb[42].mxu0  ;;  %v631_v13 = vpop.f32.mrb[42].mxu1 }
 0x16e   :  { %1478 = vst [vmem:[#allocation8 + $0x48] sm:$0xff] %v1398_v6   ;;  %v875_v14 = vadd.f32 %v1906_v36, %v819_v7  ;;  %v820_v15 = vmul.f32 %v1901_v34, %v527_v12  ;;  %v1585_v16 = vpop.f32.mrb[43].mxu0  ;;  %v901_v17 = vadd.f32 %v1906_v36, %v845_v10  ;;  %v846_v18 = vmul.f32 %v1901_v34, %v631_v13  ;;  %v1637_v19 = vpop.f32.mrb[43].mxu1 }
 0x16f   :  { %1491 = vst [vmem:[#allocation8 + $0xb0] sm:$0xff] %v1463_v9  }
 0x170   :  { %v876_v20 = vadd.f32 %v1906_v36, %v820_v15  ;;  %v950_v21 = vmax.f32 %v901_v17, 0.0  ;;  %v902_v22 = vadd.f32 %v1906_v36, %v846_v18  ;;  %v924_v23 = vmax.f32 %v875_v14, 0.0 }
 0x172   :  { %v925_v24 = vmax.f32 %v876_v20, 0.0  ;;  %v951_v25 = vmax.f32 %v902_v22, 0.0 }
 0x173   :  { %v532_v26 = vpop.f32.mrb[44].mxu0  ;;  %v636_v27 = vpop.f32.mrb[44].mxu1 }
 0x174   :  { %v1403_v28 = vpack.c.bf16 %v925_v24, %v924_v23  ;;  %v821_v29 = vmul.f32 %v1901_v34, %v532_v26  ;;  %v1588_v30 = vpop.f32.mrb[45].mxu0  ;;  %v1468_v31 = vpack.c.bf16 %v951_v25, %v950_v21  ;;  %v847_v32 = vmul.f32 %v1901_v34, %v636_v27  ;;  %v1640_v33 = vpop.f32.mrb[45].mxu1 }
 0x175   :  { %v535_v35 = vpop.f32.mrb[46].mxu0  ;;  %v639_v37 = vpop.f32.mrb[46].mxu1 }
 0x176   :  { %1479 = vst [vmem:[#allocation8 + $0x50] sm:$0xff] %v1403_v28   ;;  %v877_v38 = vadd.f32 %v1906_v36, %v821_v29  ;;  %1492 = vst [vmem:[#allocation8 + $0xb8] sm:$0xff] %v1468_v31   ;;  %v822_v39 = vmul.f32 %v1901_v34, %v535_v35  ;;  %v1589_v40 = vpop.f32.mrb[47].mxu0  ;;  %v903_v41 = vadd.f32 %v1906_v36, %v847_v32  ;;  %v1641_v42 = vpop.f32.mrb[47].mxu1 }
 0x178   :  { %v878_v43 = vadd.f32 %v1906_v36, %v822_v39  ;;  %v952_v44 = vmax.f32 %v903_v41, 0.0  ;;  %v926_v45 = vmax.f32 %v877_v38, 0.0 }
 0x17a   :  { %v927_v46 = vmax.f32 %v878_v43, 0.0  ;;  %v1349_v47 = vpack.c.bf16 %v952_v44, %v952_v44 }
 0x17b   :  { %v540_v48 = vpop.f32.mrb[48].mxu0 }
 0x17c   :  { %v1408_v49 = vpack.c.bf16 %v927_v46, %v926_v45  ;;  %1198 = vst [vmem:[#allocation8 + $0xc0] sm:$0xf] %v1349_v47  ;;  %v823_v50 = vmul.f32 %v1901_v34, %v540_v48  ;;  %v1592_v51 = vpop.f32.mrb[49].mxu0 }
 0x17d   :  { %v543_v52 = vpop.f32.mrb[50].mxu0 }
 0x17e   :  { %1480 = vst [vmem:[#allocation8 + $0x58] sm:$0xff] %v1408_v49   ;;  %v879_v53 = vadd.f32 %v1906_v36, %v823_v50  ;;  %v824_v54 = vmul.f32 %v1901_v34, %v543_v52  ;;  %v1593_v55 = vpop.f32.mrb[51].mxu0 }
 0x180   :  { %v880_v56 = vadd.f32 %v1906_v36, %v824_v54  ;;  %v928_v57 = vmax.f32 %v879_v53, 0.0 }
 0x182   :  { %v929_v58 = vmax.f32 %v880_v56, 0.0 }
 0x184   :  { %v1413_v59 = vpack.c.bf16 %v929_v58, %v928_v57 }
 0x186   :  { %1481 = vst [vmem:[#allocation8 + $0x60] sm:$0xff] %v1413_v59  }
 0x187   :  { %1753 = shalt.err (!%p1750_p6)
}
 0x188   :  { %s1754_s20 = scalar_lea.hbm %s2025_s4, 3136 }
 0x189   :  { %p1755_p7 = scmp.ne.s32.totalorder %s2025_s4, %s1754_s20  ;;  %p1758_p8 = scmp.lt.u32.totalorder %s1754_s20, %s2025_s4 }
 0x18b   :  { %p1760_p9 = pnand %p1758_p8, %p1755_p7 }
 0x18d   :  { %1763 = shalt.err (!%p1760_p9)
}
 0x18e   :  { %1210 = dma.vmem_to_hbm [thread:$0]  %s1205_s3, 3136, %s2025_s4, [#allocation5], %s1771_s25, %s1771_s25, %s1772_s26  }
 0x18f   :  { %1768 = dma.done.wait [#allocation5], 3136  }
 0x190   :  { %1769 = vsyncadd [#allocation5], 4294964160 }
 0x191   :  { %1214 = vsyncpa [#allocation4], 1 }
 0x192   :  { %1215 = vsyncpa [#allocation7], 1 }
 0x193   :  { %1216 = vsyncpa [#allocation5], 1 }

</bundles_post_ra>
